<compile_context>
chip_gen: v5e
topology: v5e:2x2
jax: 0.10.0
libtpu: 0.0.40
codegen_flags: <defaults>
</compile_context>

<pallas_src>
import functools
import math
from math import sqrt

import jax
import jax.numpy as jnp
from jax.experimental import pallas as pl
from jax.experimental.pallas import tpu as pltpu


# ----------------------------------------------------------------------------
# Kernel
# ----------------------------------------------------------------------------
def _ghost_bn(h, gamma, beta, chunks_per_step, vbs, eps):
    """BatchNorm1d (training mode) applied per ghost batch, affine folded in.

    h:           (chunks_per_step * vbs, n) f32
    gamma/beta:  (1, 1, n) f32
    """
    rows, n = h.shape
    h3 = h.reshape(chunks_per_step, vbs, n)
    mean = jnp.mean(h3, axis=1, keepdims=True)          # (cps, 1, n)
    d = h3 - mean
    var = jnp.mean(d * d, axis=1, keepdims=True)        # biased variance
    scale = gamma * jax.lax.rsqrt(var + eps)            # fold gamma
    return (d * scale + beta).reshape(rows, n)


def _glu_kernel(x_ref, wa_ref, wb_ref, gb_ref, o_ref, *,
                chunks_per_step, virtual_batch_size, eps):
    # x_ref:  (rows, in_dim)   rows = chunks_per_step * virtual_batch_size
    # wa/wb:  (in_dim, n)      pre-transposed GLU halves (n possibly padded)
    # gb_ref: (4, n)           rows = [gamma_a, beta_a, gamma_b, beta_b]
    # o_ref:  (rows, n)
    x = x_ref[...]                      # native dtype straight into the MXU
    n = wa_ref.shape[1]

    gb = gb_ref[...].astype(jnp.float32)
    ga = gb[0:1, :].reshape(1, 1, n)
    ba = gb[1:2, :].reshape(1, 1, n)
    gg = gb[2:3, :].reshape(1, 1, n)
    bg = gb[3:4, :].reshape(1, 1, n)

    # Gate half first: fewer (rows x n) f32 temporaries live at the peak.
    h_b = jnp.dot(x, wb_ref[...], preferred_element_type=jnp.float32)
    b = _ghost_bn(h_b, gg, bg, chunks_per_step, virtual_batch_size, eps)
    # sigmoid(b) == 0.5*(tanh(0.5*b)+1): routes through the EUP, frees the VPU.
    gate = 0.5 * (jnp.tanh(0.5 * b) + 1.0)

    h_a = jnp.dot(x, wa_ref[...], preferred_element_type=jnp.float32)
    a = _ghost_bn(h_a, ga, ba, chunks_per_step, virtual_batch_size, eps)

    o_ref[...] = (a * gate).astype(o_ref.dtype)


# ----------------------------------------------------------------------------
# Tiling heuristics
# ----------------------------------------------------------------------------
def _vmem_budget():
    """(capacity, block budget, vmem_limit) derived from the actual chip."""
    cap = None
    try:
        info = pltpu.get_tpu_info()
        cap = getattr(info, "vmem_capacity_bytes", None)
    except Exception:
        cap = None
    if not cap:
        cap = 64 * 1024 * 1024          # conservative: v7x per-TensorCore VMEM
    budget = min(int(0.55 * cap), 80 * 1024 * 1024)   # ~35 MiB on v7x, ~70 on v6e
    limit = min(int(0.75 * cap), 100 * 1024 * 1024)   # ~48 MiB on v7x, ~96 on v6e
    return cap, budget, limit


def _choose_chunks_per_step(num_chunks, chunk, in_dim, n_pad, itemsize,
                            budget_bytes, max_rows, weight_buffers):
    """Largest #ghost-batches per grid step that fits the VMEM budget.

    Prefers a grid of >= 4 steps (>= 2 steps per TensorCore on v7x), then
    >= 2, accounting for ragged-last-step waste when cps doesn't divide
    num_chunks.  Returns (cps, estimated_bytes).
    """
    def est_bytes(d):
        rows = d * chunk
        x_b = 2 * rows * in_dim * itemsize                    # dbl-buffered x
        o_b = 2 * rows * n_pad * itemsize                     # dbl-buffered out
        h_b = 2 * rows * (2 * n_pad) * 4                      # live f32 temps
        w_b = weight_buffers * in_dim * (2 * n_pad) * itemsize
        gb_b = weight_buffers * 8 * n_pad * 4
        return x_b + o_b + h_b + w_b + gb_b

    candidates = [d for d in range(1, num_chunks + 1)
                  if d * chunk <= max_rows and est_bytes(d) <= budget_bytes]
    if not candidates:
        return 1, est_bytes(1)

    def pick(pool):
        # Maximize useful ghost-batches per step (penalizes ragged-step waste),
        # tie-break toward smaller d (less wasted padding work).
        return max(pool,
                   key=lambda d: (num_chunks / math.ceil(num_chunks / d), -d))

    for min_steps in (4, 2):
        pool = [d for d in candidates if math.ceil(num_chunks / d) >= min_steps]
        if pool:
            d = pick(pool)
            return d, est_bytes(d)
    d = pick(candidates)
    return d, est_bytes(d)


def _pad_cols(a, n_pad):
    n = a.shape[-1]
    if n == n_pad:
        return a
    pad = [(0, 0)] * (a.ndim - 1) + [(0, n_pad - n)]
    return jnp.pad(a, pad)


# ----------------------------------------------------------------------------
# Wrapper
# ----------------------------------------------------------------------------
def glu_layer_forward(x, w_a, w_b, gamma_a, beta_a, gamma_b, beta_b, *,
                      virtual_batch_size=128, eps=1e-5,
                      max_rows_per_step=4096):
    """x: (B, in_dim); w_a/w_b: (in_dim, out_dim); gamma_*/beta_*: (out_dim,)."""
    B, in_dim = x.shape
    out_dim = w_a.shape[1]
    assert w_b.shape == (in_dim, out_dim)

    num_chunks = max(B // virtual_batch_size, 1)
    # torch.chunk(num_chunks, 0) with B divisible by num_chunks -> equal chunks.
    assert B % num_chunks == 0, "batch must split evenly into ghost batches"
    chunk = B // num_chunks

    min_sublanes = 8 if x.dtype.itemsize >= 4 else 16
    if num_chunks > 1:
        assert chunk % min_sublanes == 0, (
            "virtual batch size must be a multiple of the sublane count")

    # Lane-dense feature axis: pad out_dim to a multiple of 128 unless it is
    # already one, or so small that padding would inflate HBM write traffic.
    if out_dim % 128 != 0 and out_dim >= 64:
        n_pad = ((out_dim + 127) // 128) * 128
    else:
        n_pad = out_dim

    single_buffer_ok = hasattr(pl, "Buffered")
    weight_buffers = 1 if single_buffer_ok else 2

    vmem_cap, budget, vmem_limit = _vmem_budget()
    cps, est = _choose_chunks_per_step(
        num_chunks, chunk, in_dim, n_pad, x.dtype.itemsize,
        budget, max_rows_per_step, weight_buffers)
    # If even the chosen (possibly cps=1) block exceeds the limit estimate,
    # raise the limit toward physical capacity rather than failing outright.
    vmem_limit = max(vmem_limit, min(est + (4 << 20), int(0.95 * vmem_cap)))

    rows = cps * chunk
    grid = (pl.cdiv(num_chunks, cps),)

    # Pad the GLU halves and pack gamma/beta into one (4, n_pad) operand.
    wa_p = _pad_cols(w_a, n_pad)
    wb_p = _pad_cols(w_b, n_pad)
    gb_pack = _pad_cols(
        jnp.stack([gamma_a.reshape(-1), beta_a.reshape(-1),
                   gamma_b.reshape(-1), beta_b.reshape(-1)], axis=0), n_pad)

    kernel = functools.partial(
        _glu_kernel, chunks_per_step=cps, virtual_batch_size=chunk, eps=eps)

    def build(single_buffer_consts):
        const_kwargs = {}
        if single_buffer_consts:
            # Constants never change block index; single-buffer to save VMEM.
            const_kwargs = dict(pipeline_mode=pl.Buffered(1))

        def const_spec(shape):
            return pl.BlockSpec(shape, lambda i: (0, 0), **const_kwargs)

        return pl.pallas_call(
            kernel,
            out_shape=jax.ShapeDtypeStruct((B, n_pad), x.dtype),
            grid=grid,
            in_specs=[
                pl.BlockSpec((rows, in_dim), lambda i: (i, 0)),  # x row block
                const_spec((in_dim, n_pad)),                     # w_a (resident)
                const_spec((in_dim, n_pad)),                     # w_b (resident)
                const_spec((4, n_pad)),                          # gamma/beta pack
            ],
            out_specs=pl.BlockSpec((rows, n_pad), lambda i: (i, 0)),
            compiler_params=pltpu.CompilerParams(
                dimension_semantics=("parallel",),
                vmem_limit_bytes=vmem_limit),
        )

    args = (x, wa_p, wb_p, gb_pack)
    if single_buffer_ok:
        try:
            out = build(True)(*args)
        except Exception:
            # pipeline_mode=pl.Buffered(1) unsupported here -> default buffering.
            out = build(False)(*args)
    else:
        out = build(False)(*args)

    if n_pad != out_dim:
        out = out[:, :out_dim]
    return out


# ----------------------------------------------------------------------------
# Parameter init (matches initialize_glu / BatchNorm1d defaults)
# ----------------------------------------------------------------------------
def init_glu_params(key, input_dim, output_dim, dtype=jnp.float32):
    """Deterministic xavier_normal_ init matching initialize_glu()."""
    two_out = 2 * output_dim
    gain = sqrt((input_dim + two_out) / sqrt(input_dim))
    std = gain * sqrt(2.0 / (input_dim + two_out))   # xavier_normal_ std
    # PyTorch weight is (2*out_dim, in_dim); split into GLU halves and
    # pre-transpose each to (in_dim, out_dim) for plain [M,K]@[K,N] matmuls.
    w = (std * jax.random.normal(key, (two_out, input_dim),
                                 dtype=jnp.float32)).astype(dtype)
    w_a = w[:output_dim].T       # first half  -> gated values
    w_b = w[output_dim:].T       # second half -> gate (sigmoid)
    gamma = jnp.ones((two_out,), dtype=dtype)    # BatchNorm1d weight
    beta = jnp.zeros((two_out,), dtype=dtype)    # BatchNorm1d bias
    return (w_a, w_b,
            gamma[:output_dim], beta[:output_dim],
            gamma[output_dim:], beta[output_dim:])


if __name__ == "__main__":
    key = jax.random.PRNGKey(0)
    k_x, k_w = jax.random.split(key)

    # Small shapes: batch=32, input_dim=32, output_dim=16, virtual batch = 8
    # -> 4 ghost batches.
    B, input_dim, output_dim = 32, 32, 16
    vbs = 8

    x = jax.random.normal(k_x, (B, input_dim), dtype=jnp.float32)
    w_a, w_b, g_a, b_a, g_b, b_b = init_glu_params(k_w, input_dim, output_dim)

    out = glu_layer_forward(x, w_a, w_b, g_a, b_a, g_b, b_b,
                            virtual_batch_size=vbs)
    out = jax.block_until_ready(out)

    # Pure-JAX reference (faithful to the PyTorch forward in training mode).
    def ref(x):
        W = jnp.concatenate([w_a, w_b], axis=1)                  # (K, 2N)
        gamma = jnp.concatenate([g_a, g_b])
        beta = jnp.concatenate([b_a, b_b])
        h = x @ W
        chunks = jnp.split(h, max(B // vbs, 1), axis=0)
        res = []
        for c in chunks:
            m = c.mean(0, keepdims=True)
            v = ((c - m) ** 2).mean(0, keepdims=True)
            res.append((c - m) / jnp.sqrt(v + 1e-5) * gamma + beta)
        h = jnp.concatenate(res, 0)
        return h[:, :output_dim] * jax.nn.sigmoid(h[:, output_dim:])

    expected = ref(x)
    assert out.shape == (B, output_dim)
    assert jnp.allclose(out, expected, atol=2e-5, rtol=2e-5), (
        float(jnp.max(jnp.abs(out - expected))))
    print("KERNEL_OK")
</pallas_src>

<mosaic_0001>
module attributes {stable_mosaic.version = 11 : i64} {
  func.func @_glu_kernel(%arg0: i32, %arg1: memref<8x32xf32, #tpu.memory_space<vmem>>, %arg2: memref<32x16xf32, #tpu.memory_space<vmem>>, %arg3: memref<32x16xf32, #tpu.memory_space<vmem>>, %arg4: memref<4x16xf32, #tpu.memory_space<vmem>>, %arg5: memref<8x16xf32, #tpu.memory_space<vmem>>) attributes {dimension_semantics = [#tpu.dimension_semantics<parallel>], iteration_bounds = array<i64: 4>, scalar_prefetch = 0 : i64, scratch_operands = 0 : i64, tpu.core_type = #tpu.core_type<tc>, window_params = [{transform_indices = @transform_0, window_bounds = array<i64: 8, 32>}, {pipeline_mode = #tpu.pipeline_mode<synchronous>, transform_indices = @transform_1, window_bounds = array<i64: 32, 16>}, {pipeline_mode = #tpu.pipeline_mode<synchronous>, transform_indices = @transform_2, window_bounds = array<i64: 32, 16>}, {pipeline_mode = #tpu.pipeline_mode<synchronous>, transform_indices = @transform_3, window_bounds = array<i64: 4, 16>}, {transform_indices = @transform_4, window_bounds = array<i64: 8, 16>}]} {
    %c0 = arith.constant 0 : index
    %c0_0 = arith.constant 0 : index
    %0 = vector.load %arg1[%c0, %c0_0] : memref<8x32xf32, #tpu.memory_space<vmem>>, vector<8x32xf32>
    %c0_1 = arith.constant 0 : index
    %c0_2 = arith.constant 0 : index
    %1 = vector.load %arg4[%c0_1, %c0_2] : memref<4x16xf32, #tpu.memory_space<vmem>>, vector<4x16xf32>
    %2 = vector.extract_strided_slice %1 {offsets = [0, 0], sizes = [1, 16], strides = [1, 1]} : vector<4x16xf32> to vector<1x16xf32>
    %3 = vector.shape_cast %2 : vector<1x16xf32> to vector<1x1x16xf32>
    %4 = vector.extract_strided_slice %1 {offsets = [1, 0], sizes = [1, 16], strides = [1, 1]} : vector<4x16xf32> to vector<1x16xf32>
    %5 = vector.shape_cast %4 : vector<1x16xf32> to vector<1x1x16xf32>
    %6 = vector.extract_strided_slice %1 {offsets = [2, 0], sizes = [1, 16], strides = [1, 1]} : vector<4x16xf32> to vector<1x16xf32>
    %7 = vector.shape_cast %6 : vector<1x16xf32> to vector<1x1x16xf32>
    %8 = vector.extract_strided_slice %1 {offsets = [3, 0], sizes = [1, 16], strides = [1, 1]} : vector<4x16xf32> to vector<1x16xf32>
    %9 = vector.shape_cast %8 : vector<1x16xf32> to vector<1x1x16xf32>
    %c0_3 = arith.constant 0 : index
    %c0_4 = arith.constant 0 : index
    %10 = vector.load %arg3[%c0_3, %c0_4] : memref<32x16xf32, #tpu.memory_space<vmem>>, vector<32x16xf32>
    %cst = arith.constant dense<0.000000e+00> : vector<8x16xf32>
    %11 = tpu.matmul %0, %10, %cst {dimension_numbers = #tpu.dot_dimension_numbers<[1], [0], [0], [1], [0, 0, 1, 1], [], []>} : vector<8x32xf32>, vector<32x16xf32>, vector<8x16xf32> -> vector<8x16xf32>
    %12 = vector.shape_cast %11 : vector<8x16xf32> to vector<1x8x16xf32>
    %cst_5 = arith.constant dense<0.000000e+00> : vector<1x16xf32>
    %13 = vector.multi_reduction <add>, %12, %cst_5 [1] : vector<1x8x16xf32> to vector<1x16xf32>
    %14 = vector.shape_cast %13 : vector<1x16xf32> to vector<1x1x16xf32>
    %cst_6 = arith.constant 8.000000e+00 : f32
    %15 = vector.broadcast %cst_6 : f32 to vector<1x1x16xf32>
    %16 = arith.divf %14, %15 : vector<1x1x16xf32>
    %17 = vector.broadcast %16 : vector<1x1x16xf32> to vector<1x8x16xf32>
    %18 = arith.subf %12, %17 : vector<1x8x16xf32>
    %19 = arith.mulf %18, %18 : vector<1x8x16xf32>
    %cst_7 = arith.constant dense<0.000000e+00> : vector<1x16xf32>
    %20 = vector.multi_reduction <add>, %19, %cst_7 [1] : vector<1x8x16xf32> to vector<1x16xf32>
    %21 = vector.shape_cast %20 : vector<1x16xf32> to vector<1x1x16xf32>
    %cst_8 = arith.constant 8.000000e+00 : f32
    %22 = vector.broadcast %cst_8 : f32 to vector<1x1x16xf32>
    %23 = arith.divf %21, %22 : vector<1x1x16xf32>
    %cst_9 = arith.constant 9.99999974E-6 : f32
    %24 = vector.broadcast %cst_9 : f32 to vector<1x1x16xf32>
    %25 = arith.addf %23, %24 : vector<1x1x16xf32>
    %26 = math.rsqrt %25 : vector<1x1x16xf32>
    %27 = arith.mulf %7, %26 : vector<1x1x16xf32>
    %28 = vector.broadcast %27 : vector<1x1x16xf32> to vector<1x8x16xf32>
    %29 = arith.mulf %18, %28 : vector<1x8x16xf32>
    %30 = vector.broadcast %9 : vector<1x1x16xf32> to vector<1x8x16xf32>
    %31 = arith.addf %29, %30 : vector<1x8x16xf32>
    %32 = vector.shape_cast %31 : vector<1x8x16xf32> to vector<8x16xf32>
    %cst_10 = arith.constant 5.000000e-01 : f32
    %33 = vector.broadcast %cst_10 : f32 to vector<8x16xf32>
    %34 = arith.mulf %33, %32 : vector<8x16xf32>
    %35 = math.tanh %34 : vector<8x16xf32>
    %cst_11 = arith.constant 1.000000e+00 : f32
    %36 = vector.broadcast %cst_11 : f32 to vector<8x16xf32>
    %37 = arith.addf %35, %36 : vector<8x16xf32>
    %cst_12 = arith.constant 5.000000e-01 : f32
    %38 = vector.broadcast %cst_12 : f32 to vector<8x16xf32>
    %39 = arith.mulf %38, %37 : vector<8x16xf32>
    %c0_13 = arith.constant 0 : index
    %c0_14 = arith.constant 0 : index
    %40 = vector.load %arg2[%c0_13, %c0_14] : memref<32x16xf32, #tpu.memory_space<vmem>>, vector<32x16xf32>
    %cst_15 = arith.constant dense<0.000000e+00> : vector<8x16xf32>
    %41 = tpu.matmul %0, %40, %cst_15 {dimension_numbers = #tpu.dot_dimension_numbers<[1], [0], [0], [1], [0, 0, 1, 1], [], []>} : vector<8x32xf32>, vector<32x16xf32>, vector<8x16xf32> -> vector<8x16xf32>
    %42 = vector.shape_cast %41 : vector<8x16xf32> to vector<1x8x16xf32>
    %cst_16 = arith.constant dense<0.000000e+00> : vector<1x16xf32>
    %43 = vector.multi_reduction <add>, %42, %cst_16 [1] : vector<1x8x16xf32> to vector<1x16xf32>
    %44 = vector.shape_cast %43 : vector<1x16xf32> to vector<1x1x16xf32>
    %cst_17 = arith.constant 8.000000e+00 : f32
    %45 = vector.broadcast %cst_17 : f32 to vector<1x1x16xf32>
    %46 = arith.divf %44, %45 : vector<1x1x16xf32>
    %47 = vector.broadcast %46 : vector<1x1x16xf32> to vector<1x8x16xf32>
    %48 = arith.subf %42, %47 : vector<1x8x16xf32>
    %49 = arith.mulf %48, %48 : vector<1x8x16xf32>
    %cst_18 = arith.constant dense<0.000000e+00> : vector<1x16xf32>
    %50 = vector.multi_reduction <add>, %49, %cst_18 [1] : vector<1x8x16xf32> to vector<1x16xf32>
    %51 = vector.shape_cast %50 : vector<1x16xf32> to vector<1x1x16xf32>
    %cst_19 = arith.constant 8.000000e+00 : f32
    %52 = vector.broadcast %cst_19 : f32 to vector<1x1x16xf32>
    %53 = arith.divf %51, %52 : vector<1x1x16xf32>
    %cst_20 = arith.constant 9.99999974E-6 : f32
    %54 = vector.broadcast %cst_20 : f32 to vector<1x1x16xf32>
    %55 = arith.addf %53, %54 : vector<1x1x16xf32>
    %56 = math.rsqrt %55 : vector<1x1x16xf32>
    %57 = arith.mulf %3, %56 : vector<1x1x16xf32>
    %58 = vector.broadcast %57 : vector<1x1x16xf32> to vector<1x8x16xf32>
    %59 = arith.mulf %48, %58 : vector<1x8x16xf32>
    %60 = vector.broadcast %5 : vector<1x1x16xf32> to vector<1x8x16xf32>
    %61 = arith.addf %59, %60 : vector<1x8x16xf32>
    %62 = vector.shape_cast %61 : vector<1x8x16xf32> to vector<8x16xf32>
    %63 = arith.mulf %62, %39 : vector<8x16xf32>
    %c0_21 = arith.constant 0 : index
    %c0_22 = arith.constant 0 : index
    %64 = vector.load %arg5[%c0_21, %c0_22] : memref<8x16xf32, #tpu.memory_space<vmem>>, vector<8x16xf32>
    tpu.vector_store %arg5[%c0_21, %c0_22], %63 {strides = array<i32>} : memref<8x16xf32, #tpu.memory_space<vmem>>, vector<8x16xf32>,
    return
  }
  func.func @transform_0(%arg0: i32) -> (i32, i32) {
    %c0_i32 = arith.constant 0 : i32
    %c0_i32_0 = arith.constant 0 : i32
    return %arg0, %c0_i32 : i32, i32
  }
  func.func @transform_1(%arg0: i32) -> (i32, i32) {
    %c0_i32 = arith.constant 0 : i32
    %c0_i32_0 = arith.constant 0 : i32
    %c0_i32_1 = arith.constant 0 : i32
    return %c0_i32, %c0_i32_0 : i32, i32
  }
  func.func @transform_2(%arg0: i32) -> (i32, i32) {
    %c0_i32 = arith.constant 0 : i32
    %c0_i32_0 = arith.constant 0 : i32
    %c0_i32_1 = arith.constant 0 : i32
    return %c0_i32, %c0_i32_0 : i32, i32
  }
  func.func @transform_3(%arg0: i32) -> (i32, i32) {
    %c0_i32 = arith.constant 0 : i32
    %c0_i32_0 = arith.constant 0 : i32
    %c0_i32_1 = arith.constant 0 : i32
    return %c0_i32, %c0_i32_0 : i32, i32
  }
  func.func @transform_4(%arg0: i32) -> (i32, i32) {
    %c0_i32 = arith.constant 0 : i32
    %c0_i32_0 = arith.constant 0 : i32
    return %arg0, %c0_i32 : i32, i32
  }
}

module attributes {stable_mosaic.version = 11 : i64} {
  func.func @_glu_kernel(%arg0: i32, %arg1: memref<8x32xf32, #tpu.memory_space<vmem>>, %arg2: memref<32x16xf32, #tpu.memory_space<vmem>>, %arg3: memref<32x16xf32, #tpu.memory_space<vmem>>, %arg4: memref<4x16xf32, #tpu.memory_space<vmem>>, %arg5: memref<8x16xf32, #tpu.memory_space<vmem>>) attributes {dimension_semantics = [#tpu.dimension_semantics<parallel>], iteration_bounds = array<i64: 4>, scalar_prefetch = 0 : i64, scratch_operands = 0 : i64, tpu.core_type = #tpu.core_type<tc>, window_params = [{transform_indices = @transform_0, window_bounds = array<i64: 8, 32>}, {pipeline_mode = #tpu.pipeline_mode<synchronous>, transform_indices = @transform_1, window_bounds = array<i64: 32, 16>}, {pipeline_mode = #tpu.pipeline_mode<synchronous>, transform_indices = @transform_2, window_bounds = array<i64: 32, 16>}, {pipeline_mode = #tpu.pipeline_mode<synchronous>, transform_indices = @transform_3, window_bounds = array<i64: 4, 16>}, {transform_indices = @transform_4, window_bounds = array<i64: 8, 16>}]} {
    %c0 = arith.constant 0 : index
    %c0_0 = arith.constant 0 : index
    %0 = vector.load %arg1[%c0, %c0_0] : memref<8x32xf32, #tpu.memory_space<vmem>>, vector<8x32xf32>
    %c0_1 = arith.constant 0 : index
    %c0_2 = arith.constant 0 : index
    %1 = vector.load %arg4[%c0_1, %c0_2] : memref<4x16xf32, #tpu.memory_space<vmem>>, vector<4x16xf32>
    %2 = vector.extract_strided_slice %1 {offsets = [0, 0], sizes = [1, 16], strides = [1, 1]} : vector<4x16xf32> to vector<1x16xf32>
    %3 = vector.shape_cast %2 : vector<1x16xf32> to vector<1x1x16xf32>
    %4 = vector.extract_strided_slice %1 {offsets = [1, 0], sizes = [1, 16], strides = [1, 1]} : vector<4x16xf32> to vector<1x16xf32>
    %5 = vector.shape_cast %4 : vector<1x16xf32> to vector<1x1x16xf32>
    %6 = vector.extract_strided_slice %1 {offsets = [2, 0], sizes = [1, 16], strides = [1, 1]} : vector<4x16xf32> to vector<1x16xf32>
    %7 = vector.shape_cast %6 : vector<1x16xf32> to vector<1x1x16xf32>
    %8 = vector.extract_strided_slice %1 {offsets = [3, 0], sizes = [1, 16], strides = [1, 1]} : vector<4x16xf32> to vector<1x16xf32>
    %9 = vector.shape_cast %8 : vector<1x16xf32> to vector<1x1x16xf32>
    %c0_3 = arith.constant 0 : index
    %c0_4 = arith.constant 0 : index
    %10 = vector.load %arg3[%c0_3, %c0_4] : memref<32x16xf32, #tpu.memory_space<vmem>>, vector<32x16xf32>
    %cst = arith.constant dense<0.000000e+00> : vector<8x16xf32>
    %11 = tpu.matmul %0, %10, %cst {dimension_numbers = #tpu.dot_dimension_numbers<[1], [0], [0], [1], [0, 0, 1, 1], [], []>} : vector<8x32xf32>, vector<32x16xf32>, vector<8x16xf32> -> vector<8x16xf32>
    %12 = vector.shape_cast %11 : vector<8x16xf32> to vector<1x8x16xf32>
    %cst_5 = arith.constant dense<0.000000e+00> : vector<1x16xf32>
    %13 = vector.multi_reduction <add>, %12, %cst_5 [1] : vector<1x8x16xf32> to vector<1x16xf32>
    %14 = vector.shape_cast %13 : vector<1x16xf32> to vector<1x1x16xf32>
    %cst_6 = arith.constant 8.000000e+00 : f32
    %15 = vector.broadcast %cst_6 : f32 to vector<1x1x16xf32>
    %16 = arith.divf %14, %15 : vector<1x1x16xf32>
    %17 = vector.broadcast %16 : vector<1x1x16xf32> to vector<1x8x16xf32>
    %18 = arith.subf %12, %17 : vector<1x8x16xf32>
    %19 = arith.mulf %18, %18 : vector<1x8x16xf32>
    %cst_7 = arith.constant dense<0.000000e+00> : vector<1x16xf32>
    %20 = vector.multi_reduction <add>, %19, %cst_7 [1] : vector<1x8x16xf32> to vector<1x16xf32>
    %21 = vector.shape_cast %20 : vector<1x16xf32> to vector<1x1x16xf32>
    %cst_8 = arith.constant 8.000000e+00 : f32
    %22 = vector.broadcast %cst_8 : f32 to vector<1x1x16xf32>
    %23 = arith.divf %21, %22 : vector<1x1x16xf32>
    %cst_9 = arith.constant 9.99999974E-6 : f32
    %24 = vector.broadcast %cst_9 : f32 to vector<1x1x16xf32>
    %25 = arith.addf %23, %24 : vector<1x1x16xf32>
    %26 = math.rsqrt %25 : vector<1x1x16xf32>
    %27 = arith.mulf %7, %26 : vector<1x1x16xf32>
    %28 = vector.broadcast %27 : vector<1x1x16xf32> to vector<1x8x16xf32>
    %29 = arith.mulf %18, %28 : vector<1x8x16xf32>
    %30 = vector.broadcast %9 : vector<1x1x16xf32> to vector<1x8x16xf32>
    %31 = arith.addf %29, %30 : vector<1x8x16xf32>
    %32 = vector.shape_cast %31 : vector<1x8x16xf32> to vector<8x16xf32>
    %cst_10 = arith.constant 5.000000e-01 : f32
    %33 = vector.broadcast %cst_10 : f32 to vector<8x16xf32>
    %34 = arith.mulf %33, %32 : vector<8x16xf32>
    %35 = math.tanh %34 : vector<8x16xf32>
    %cst_11 = arith.constant 1.000000e+00 : f32
    %36 = vector.broadcast %cst_11 : f32 to vector<8x16xf32>
    %37 = arith.addf %35, %36 : vector<8x16xf32>
    %cst_12 = arith.constant 5.000000e-01 : f32
    %38 = vector.broadcast %cst_12 : f32 to vector<8x16xf32>
    %39 = arith.mulf %38, %37 : vector<8x16xf32>
    %c0_13 = arith.constant 0 : index
    %c0_14 = arith.constant 0 : index
    %40 = vector.load %arg2[%c0_13, %c0_14] : memref<32x16xf32, #tpu.memory_space<vmem>>, vector<32x16xf32>
    %cst_15 = arith.constant dense<0.000000e+00> : vector<8x16xf32>
    %41 = tpu.matmul %0, %40, %cst_15 {dimension_numbers = #tpu.dot_dimension_numbers<[1], [0], [0], [1], [0, 0, 1, 1], [], []>} : vector<8x32xf32>, vector<32x16xf32>, vector<8x16xf32> -> vector<8x16xf32>
    %42 = vector.shape_cast %41 : vector<8x16xf32> to vector<1x8x16xf32>
    %cst_16 = arith.constant dense<0.000000e+00> : vector<1x16xf32>
    %43 = vector.multi_reduction <add>, %42, %cst_16 [1] : vector<1x8x16xf32> to vector<1x16xf32>
    %44 = vector.shape_cast %43 : vector<1x16xf32> to vector<1x1x16xf32>
    %cst_17 = arith.constant 8.000000e+00 : f32
    %45 = vector.broadcast %cst_17 : f32 to vector<1x1x16xf32>
    %46 = arith.divf %44, %45 : vector<1x1x16xf32>
    %47 = vector.broadcast %46 : vector<1x1x16xf32> to vector<1x8x16xf32>
    %48 = arith.subf %42, %47 : vector<1x8x16xf32>
    %49 = arith.mulf %48, %48 : vector<1x8x16xf32>
    %cst_18 = arith.constant dense<0.000000e+00> : vector<1x16xf32>
    %50 = vector.multi_reduction <add>, %49, %cst_18 [1] : vector<1x8x16xf32> to vector<1x16xf32>
    %51 = vector.shape_cast %50 : vector<1x16xf32> to vector<1x1x16xf32>
    %cst_19 = arith.constant 8.000000e+00 : f32
    %52 = vector.broadcast %cst_19 : f32 to vector<1x1x16xf32>
    %53 = arith.divf %51, %52 : vector<1x1x16xf32>
    %cst_20 = arith.constant 9.99999974E-6 : f32
    %54 = vector.broadcast %cst_20 : f32 to vector<1x1x16xf32>
    %55 = arith.addf %53, %54 : vector<1x1x16xf32>
    %56 = math.rsqrt %55 : vector<1x1x16xf32>
    %57 = arith.mulf %3, %56 : vector<1x1x16xf32>
    %58 = vector.broadcast %57 : vector<1x1x16xf32> to vector<1x8x16xf32>
    %59 = arith.mulf %48, %58 : vector<1x8x16xf32>
    %60 = vector.broadcast %5 : vector<1x1x16xf32> to vector<1x8x16xf32>
    %61 = arith.addf %59, %60 : vector<1x8x16xf32>
    %62 = vector.shape_cast %61 : vector<1x8x16xf32> to vector<8x16xf32>
    %63 = arith.mulf %62, %39 : vector<8x16xf32>
    %c0_21 = arith.constant 0 : index
    %c0_22 = arith.constant 0 : index
    %64 = vector.load %arg5[%c0_21, %c0_22] : memref<8x16xf32, #tpu.memory_space<vmem>>, vector<8x16xf32>
    tpu.vector_store %arg5[%c0_21, %c0_22], %63 {strides = array<i32>} : memref<8x16xf32, #tpu.memory_space<vmem>>, vector<8x16xf32>,
    return
  }
  func.func @transform_0(%arg0: i32) -> (i32, i32) {
    %c0_i32 = arith.constant 0 : i32
    %c0_i32_0 = arith.constant 0 : i32
    return %arg0, %c0_i32 : i32, i32
  }
  func.func @transform_1(%arg0: i32) -> (i32, i32) {
    %c0_i32 = arith.constant 0 : i32
    %c0_i32_0 = arith.constant 0 : i32
    %c0_i32_1 = arith.constant 0 : i32
    return %c0_i32, %c0_i32_0 : i32, i32
  }
  func.func @transform_2(%arg0: i32) -> (i32, i32) {
    %c0_i32 = arith.constant 0 : i32
    %c0_i32_0 = arith.constant 0 : i32
    %c0_i32_1 = arith.constant 0 : i32
    return %c0_i32, %c0_i32_0 : i32, i32
  }
  func.func @transform_3(%arg0: i32) -> (i32, i32) {
    %c0_i32 = arith.constant 0 : i32
    %c0_i32_0 = arith.constant 0 : i32
    %c0_i32_1 = arith.constant 0 : i32
    return %c0_i32, %c0_i32_0 : i32, i32
  }
  func.func @transform_4(%arg0: i32) -> (i32, i32) {
    %c0_i32 = arith.constant 0 : i32
    %c0_i32_0 = arith.constant 0 : i32
    return %arg0, %c0_i32 : i32, i32
  }
}

</mosaic_0001>

<bundles_post_ra>
// kernel: tpu_custom_call.1
= control target key start
LH: loop header
LB: loop body
LE: loop exit
PB: predicated region body
PF: predicated region fallthrough
CT: control target
= control target key end

     0   :  { %s444_s15 = smov 0   ;;  %s500_s0 = inlined_call_operand.vmem [shape: f32[32,32], index: 0, kind: input, shape index: {}]   ;;  %s501_s1 = inlined_call_operand.vmem [shape: f32[32,16], index: 1, kind: input, shape index: {}]   ;;  %s502_s2 = inlined_call_operand.vmem [shape: f32[32,16], index: 2, kind: input, shape index: {}]   ;;  %s503_s3 = inlined_call_operand.vmem [shape: f32[4,16], index: 3, kind: input, shape index: {}]   ;;  %s504_s4 = inlined_call_operand.vmem [shape: f32[32,16], index: 4, kind: output, shape index: {}]  }
   0x1 LB: > { %s382_s16 = sadd.s32 4294967295, %s416_s15   ;;  %p386_p0 = scmp.ge.s32.totalorder %s416_s15, 1  ;;  %s416_s15 = sphi %s444_s15, %s14_s15  }
   0x2   : > { %p161_p1 = scmp.lt.s32.totalorder %s416_s15, 5 }
   0x4   : > { %p162_p2 = pnand %p386_p0, %p161_p1 }
   0x5   : > { %p185_p3 = scmp.lt.s32.totalorder (!%p162_p2), %s382_s16, 3 }
   0x6   : > { %165 = sbr.rel (%p162_p2) target bundleno = 223 (0xdf), region = 36 }
   0xb   : > { %v198_v0 = vld [vmem:[%s502_s2 + $0x18] sm:$0xff]  ;;  %v197_v2 = vld [vmem:[%s502_s2 + $0x10] sm:$0xff]  ;;  %v196_v4 = vld [vmem:[%s502_s2 + $0x8] sm:$0xff]  ;;  %s506_s16 = smov (!%p185_p3, %s382_s16), 3  ;;  %vm199_vm0 = vcmask 261120   ;;  %v418_v9 = vmov 8.0  }
   0xc   : > { %v272_v1 = vld [vmem:[%s501_s1 + $0x18] sm:$0xff]  ;;  %215 = vmatpush.msra.mxu0 %v198_v0  ;;  %v271_v3 = vld [vmem:[%s501_s1 + $0x10] sm:$0xff]  ;;  %v270_v5 = vld [vmem:[%s501_s1 + $0x8] sm:$0xff]  ;;  %s387_s7 = sshll.u32 %s506_s16, 3  ;;  %402 = vrcp.f32 %v418_v9  ;;  %vm223_vm1 = vcmask 130048  }
   0xd   : > { %285 = vmatpush.msra.mxu1 %v272_v1  ;;  %v195_v6 = vld [vmem:[%s502_s2] sm:$0xff]  ;;  %s188_s10 = scalar_lea.vmem %s500_s0, %s387_s7  ;;  %s192_s17 = scalar_lea.vmem %s504_s4, %s387_s7 }
   0xe   : > { %216 = vmatpush.msra.mxu0 %v197_v2  ;;  %v269_v7 = vld [vmem:[%s501_s1] sm:$0xff] }
   0xf   : > { %286 = vmatpush.msra.mxu1 %v271_v3  ;;  %v193_v8 = vld [vmem:[%s188_s10] sm:$0xff] }
  0x10   : > { %217 = vmatpush.msra.mxu0 %v196_v4  ;;  %v194_v2 = vld [vmem:[%s503_s3] sm:$0xf] }
  0x11   : > { %287 = vmatpush.msra.mxu1 %v270_v5 }
  0x12   : > { %218 = vmatpush.msra.mxu0 %v195_v6  ;;  %v403_v10 = vpop.eup %402 }
  0x13   : > { %288 = vmatpush.msra.mxu1 %v269_v7  ;;  %389 = vmatmul.msk.f32.vlgmr.msra.gmra.mxu0 %vm199_vm0, %v193_v8  ;;  %v232_v11 = vmul.f32 8.0, %v403_v10  ;;  %vm236_vm2 = vweird.f32 %v403_v10 }
  0x14   : > { %390 = vmatmul.msk.f32.vlgmr.msra.gmra.mxu1 %vm199_vm0, %v193_v8  ;;  %v263_v8 = vperm.slane %v194_v2, 3 }
  0x15   : > { %v233_v12 = vsub.f32 1.0, %v232_v11 }
  0x17   : > { %v234_v19 = vmul.f32 %v403_v10, %v233_v12 }
  0x19   : > { %v235_v24 = vadd.f32 %v403_v10, %v234_v19 }
  0x1b   : > { %v237_v29 = vsel %vm236_vm2, %v403_v10, %v235_v24 }
  0x90   : > { %v220_v13 = vpop.f32.mrf.mxu0 }
  0x91   : > { %v290_v14 = vpop.f32.mrf.mxu1  ;;  %v224_v15 = vsel %vm223_vm1, %v220_v13, 0.0 }
  0x92   : > { %v293_v16 = vsel %vm223_vm1, %v290_v14, 0.0  ;;  %v225_v17 = vrot.slane %v224_v15, 4 }
  0x93   : > { %v294_v18 = vrot.slane %v293_v16, 4 }
  0x94   : > { %v226_v20 = vadd.f32 %v225_v17, %v224_v15 }
  0x95   : > { %v295_v21 = vadd.f32 %v294_v18, %v293_v16  ;;  %v325_v16 = vperm.slane %v194_v2, 1 }
  0x96   : > { %v227_v22 = vrot.slane %v226_v20, 2 }
  0x97   : > { %v296_v23 = vrot.slane %v295_v21, 2 }
  0x98   : > { %v228_v25 = vadd.f32 %v227_v22, %v226_v20 }
  0x99   : > { %v297_v26 = vadd.f32 %v296_v23, %v295_v21 }
  0x9a   : > { %v229_v27 = vrot.slane %v228_v25, 1 }
  0x9b   : > { %v298_v28 = vrot.slane %v297_v26, 1 }
  0x9c   : > { %v230_v30 = vadd.f32 %v229_v27, %v228_v25 }
  0x9d   : > { %v299_v31 = vadd.f32 %v298_v28, %v297_v26 }
  0x9e   : > { %v238_v32 = vmul.f32 %v237_v29, %v230_v30 }
  0x9f   : > { %v300_v33 = vmul.f32 %v299_v31, %v237_v29 }
  0xa0   : > { %v239_v34 = vsub.f32 %v220_v13, %v238_v32 }
  0xa1   : > { %v301_v35 = vsub.f32 %v290_v14, %v300_v33 }
  0xa2   : > { %v240_v36 = vmul.f32 %v239_v34, %v239_v34 }
  0xa3   : > { %v302_v37 = vmul.f32 %v301_v35, %v301_v35 }
  0xa4   : > { %v241_v38 = vsel %vm223_vm1, %v240_v36, 0.0 }
  0xa5   : > { %v303_v39 = vsel %vm223_vm1, %v302_v37, 0.0  ;;  %v242_v40 = vrot.slane %v241_v38, 4 }
  0xa6   : > { %v304_v41 = vrot.slane %v303_v39, 4 }
  0xa7   : > { %v243_v42 = vadd.f32 %v242_v40, %v241_v38 }
  0xa8   : > { %v305_v43 = vadd.f32 %v304_v41, %v303_v39 }
  0xa9   : > { %v244_v44 = vrot.slane %v243_v42, 2 }
  0xaa   : > { %v306_v45 = vrot.slane %v305_v43, 2 }
  0xab   : > { %v245_v46 = vadd.f32 %v244_v44, %v243_v42 }
  0xac   : > { %v307_v47 = vadd.f32 %v306_v45, %v305_v43 }
  0xad   : > { %v246_v48 = vrot.slane %v245_v46, 1 }
  0xae   : > { %v308_v49 = vrot.slane %v307_v47, 1 }
  0xaf   : > { %v247_v50 = vadd.f32 %v246_v48, %v245_v46 }
  0xb0   : > { %v309_v51 = vadd.f32 %v308_v49, %v307_v47 }
  0xb1   : > { %v248_v52 = vmul.f32 %v247_v50, %v237_v29 }
  0xb2   : > { %v310_v53 = vmul.f32 %v309_v51, %v237_v29 }
  0xb3   : > { %v249_v54 = vadd.f32 1e-05, %v248_v52 }
  0xb4   : > { %v311_v55 = vadd.f32 1e-05, %v310_v53 }
  0xb5   : > { %404 = vrsqrt.f32 %v249_v54  ;;  %vm256_vm4 = vweird.f32 %v249_v54 }
  0xb6   : > { %406 = vrsqrt.f32 %v311_v55  ;;  %vm318_vm7 = vweird.f32 %v311_v55 }
  0xbb   : > { %v405_v56 = vpop.eup %404 }
  0xbc   : > { %v407_v57 = vpop.eup %406  ;;  %v251_v58 = vmul.f32 %v405_v56, %v249_v54  ;;  %vm257_vm3 = vweird.f32 %v405_v56 }
  0xbd   : > { %v313_v59 = vmul.f32 %v407_v57, %v311_v55  ;;  %vm258_vm5 = vmor %vm256_vm4, %vm257_vm3  ;;  %vm319_vm6 = vweird.f32 %v407_v57 }
  0xbe   : > { %v252_v60 = vmul.f32 %v405_v56, %v251_v58  ;;  %vm320_vm8 = vmor %vm318_vm7, %vm319_vm6 }
  0xbf   : > { %v314_v61 = vmul.f32 %v407_v57, %v313_v59 }
  0xc0   : > { %v253_v62 = vmul.f32 0.5, %v252_v60 }
  0xc1   : > { %v315_v63 = vmul.f32 0.5, %v314_v61 }
  0xc2   : > { %v254_v0 = vsub.f32 1.5, %v253_v62 }
  0xc3   : > { %v316_v1 = vsub.f32 1.5, %v315_v63 }
  0xc4   : > { %v255_v3 = vmul.f32 %v405_v56, %v254_v0 }
  0xc5   : > { %v317_v6 = vmul.f32 %v407_v57, %v316_v1 }
  0xc6   : > { %v259_v4 = vsel %vm258_vm5, %v405_v56, %v255_v3 }
  0xc7   : > { %v260_v5 = vmul.f32 %v259_v4, %v194_v2  ;;  %v321_v10 = vsel %vm320_vm8, %v407_v57, %v317_v6 }
  0xc8   : > { %v322_v12 = vmul.f32 %v321_v10, %v194_v2 }
  0xc9   : > { %v261_v7 = vperm.slane %v260_v5, 2 }
  0xca   : > { %v323_v14 = vperm.slane %v322_v12, 0 }
  0xcb   : > { %v262_v9 = vmul.f32 %v261_v7, %v239_v34 }
  0xcc   : > { %v324_v15 = vmul.f32 %v323_v14, %v301_v35 }
  0xcd   : > { %v264_v11 = vadd.f32 %v263_v8, %v262_v9 }
  0xce   : > { %v326_v20 = vadd.f32 %v325_v16, %v324_v15 }
  0xcf   : > { %v265_v13 = vmul.f32 0.5, %v264_v11 }
  0xd1   : > { %408 = vtanh.f32 %v265_v13 }
  0xd7   : > { %v409_v17 = vpop.eup %408 }
  0xd8   : > { %v267_v18 = vadd.f32 1.0, %v409_v17 }
  0xda   : > { %v268_v19 = vmul.f32 0.5, %v267_v18 }
  0xdc   : > { %v327_v21 = vmul.f32 %v326_v20, %v268_v19 }
  0xde   : > { %328 = vst.msk [vmem:[%s192_s17] sm:$0xff] %vm223_vm1, %v327_v21 }
  0xdf PF: > { %s14_s15 = sadd.s32 1, %s416_s15  }
  0xe0   : > { %p11_p4 = scmp.ge.s32.totalorder %s14_s15, 6  }
  0xe2   :  { %13 = sbr.rel (!%p11_p4) target bundleno = 1 (0x1), region = 66 }

// kernel: tpu_custom_call.1
= control target key start
LH: loop header
LB: loop body
LE: loop exit
PB: predicated region body
PF: predicated region fallthrough
CT: control target
= control target key end

     0   :  { %s444_s15 = smov 0   ;;  %s500_s0 = inlined_call_operand.vmem [shape: f32[32,32], index: 0, kind: input, shape index: {}]   ;;  %s501_s1 = inlined_call_operand.vmem [shape: f32[32,16], index: 1, kind: input, shape index: {}]   ;;  %s502_s2 = inlined_call_operand.vmem [shape: f32[32,16], index: 2, kind: input, shape index: {}]   ;;  %s503_s3 = inlined_call_operand.vmem [shape: f32[4,16], index: 3, kind: input, shape index: {}]   ;;  %s504_s4 = inlined_call_operand.vmem [shape: f32[32,16], index: 4, kind: output, shape index: {}]  }
   0x1 LB: > { %s382_s16 = sadd.s32 4294967295, %s416_s15   ;;  %p386_p0 = scmp.ge.s32.totalorder %s416_s15, 1  ;;  %s416_s15 = sphi %s444_s15, %s14_s15  }
   0x2   : > { %p161_p1 = scmp.lt.s32.totalorder %s416_s15, 5 }
   0x4   : > { %p162_p2 = pnand %p386_p0, %p161_p1 }
   0x5   : > { %p185_p3 = scmp.lt.s32.totalorder (!%p162_p2), %s382_s16, 3 }
   0x6   : > { %165 = sbr.rel (%p162_p2) target bundleno = 223 (0xdf), region = 36 }
   0xb   : > { %v198_v0 = vld [vmem:[%s502_s2 + $0x18] sm:$0xff]  ;;  %v197_v2 = vld [vmem:[%s502_s2 + $0x10] sm:$0xff]  ;;  %v196_v4 = vld [vmem:[%s502_s2 + $0x8] sm:$0xff]  ;;  %s506_s16 = smov (!%p185_p3, %s382_s16), 3  ;;  %vm199_vm0 = vcmask 261120   ;;  %v418_v9 = vmov 8.0  }
   0xc   : > { %v272_v1 = vld [vmem:[%s501_s1 + $0x18] sm:$0xff]  ;;  %215 = vmatpush.msra.mxu0 %v198_v0  ;;  %v271_v3 = vld [vmem:[%s501_s1 + $0x10] sm:$0xff]  ;;  %v270_v5 = vld [vmem:[%s501_s1 + $0x8] sm:$0xff]  ;;  %s387_s7 = sshll.u32 %s506_s16, 3  ;;  %402 = vrcp.f32 %v418_v9  ;;  %vm223_vm1 = vcmask 130048  }
   0xd   : > { %285 = vmatpush.msra.mxu1 %v272_v1  ;;  %v195_v6 = vld [vmem:[%s502_s2] sm:$0xff]  ;;  %s188_s10 = scalar_lea.vmem %s500_s0, %s387_s7  ;;  %s192_s17 = scalar_lea.vmem %s504_s4, %s387_s7 }
   0xe   : > { %216 = vmatpush.msra.mxu0 %v197_v2  ;;  %v269_v7 = vld [vmem:[%s501_s1] sm:$0xff] }
   0xf   : > { %286 = vmatpush.msra.mxu1 %v271_v3  ;;  %v193_v8 = vld [vmem:[%s188_s10] sm:$0xff] }
  0x10   : > { %217 = vmatpush.msra.mxu0 %v196_v4  ;;  %v194_v2 = vld [vmem:[%s503_s3] sm:$0xf] }
  0x11   : > { %287 = vmatpush.msra.mxu1 %v270_v5 }
  0x12   : > { %218 = vmatpush.msra.mxu0 %v195_v6  ;;  %v403_v10 = vpop.eup %402 }
  0x13   : > { %288 = vmatpush.msra.mxu1 %v269_v7  ;;  %389 = vmatmul.msk.f32.vlgmr.msra.gmra.mxu0 %vm199_vm0, %v193_v8  ;;  %v232_v11 = vmul.f32 8.0, %v403_v10  ;;  %vm236_vm2 = vweird.f32 %v403_v10 }
  0x14   : > { %390 = vmatmul.msk.f32.vlgmr.msra.gmra.mxu1 %vm199_vm0, %v193_v8  ;;  %v263_v8 = vperm.slane %v194_v2, 3 }
  0x15   : > { %v233_v12 = vsub.f32 1.0, %v232_v11 }
  0x17   : > { %v234_v19 = vmul.f32 %v403_v10, %v233_v12 }
  0x19   : > { %v235_v24 = vadd.f32 %v403_v10, %v234_v19 }
  0x1b   : > { %v237_v29 = vsel %vm236_vm2, %v403_v10, %v235_v24 }
  0x90   : > { %v220_v13 = vpop.f32.mrf.mxu0 }
  0x91   : > { %v290_v14 = vpop.f32.mrf.mxu1  ;;  %v224_v15 = vsel %vm223_vm1, %v220_v13, 0.0 }
  0x92   : > { %v293_v16 = vsel %vm223_vm1, %v290_v14, 0.0  ;;  %v225_v17 = vrot.slane %v224_v15, 4 }
  0x93   : > { %v294_v18 = vrot.slane %v293_v16, 4 }
  0x94   : > { %v226_v20 = vadd.f32 %v225_v17, %v224_v15 }
  0x95   : > { %v295_v21 = vadd.f32 %v294_v18, %v293_v16  ;;  %v325_v16 = vperm.slane %v194_v2, 1 }
  0x96   : > { %v227_v22 = vrot.slane %v226_v20, 2 }
  0x97   : > { %v296_v23 = vrot.slane %v295_v21, 2 }
  0x98   : > { %v228_v25 = vadd.f32 %v227_v22, %v226_v20 }
  0x99   : > { %v297_v26 = vadd.f32 %v296_v23, %v295_v21 }
  0x9a   : > { %v229_v27 = vrot.slane %v228_v25, 1 }
  0x9b   : > { %v298_v28 = vrot.slane %v297_v26, 1 }
  0x9c   : > { %v230_v30 = vadd.f32 %v229_v27, %v228_v25 }
  0x9d   : > { %v299_v31 = vadd.f32 %v298_v28, %v297_v26 }
  0x9e   : > { %v238_v32 = vmul.f32 %v237_v29, %v230_v30 }
  0x9f   : > { %v300_v33 = vmul.f32 %v299_v31, %v237_v29 }
  0xa0   : > { %v239_v34 = vsub.f32 %v220_v13, %v238_v32 }
  0xa1   : > { %v301_v35 = vsub.f32 %v290_v14, %v300_v33 }
  0xa2   : > { %v240_v36 = vmul.f32 %v239_v34, %v239_v34 }
  0xa3   : > { %v302_v37 = vmul.f32 %v301_v35, %v301_v35 }
  0xa4   : > { %v241_v38 = vsel %vm223_vm1, %v240_v36, 0.0 }
  0xa5   : > { %v303_v39 = vsel %vm223_vm1, %v302_v37, 0.0  ;;  %v242_v40 = vrot.slane %v241_v38, 4 }
  0xa6   : > { %v304_v41 = vrot.slane %v303_v39, 4 }
  0xa7   : > { %v243_v42 = vadd.f32 %v242_v40, %v241_v38 }
  0xa8   : > { %v305_v43 = vadd.f32 %v304_v41, %v303_v39 }
  0xa9   : > { %v244_v44 = vrot.slane %v243_v42, 2 }
  0xaa   : > { %v306_v45 = vrot.slane %v305_v43, 2 }
  0xab   : > { %v245_v46 = vadd.f32 %v244_v44, %v243_v42 }
  0xac   : > { %v307_v47 = vadd.f32 %v306_v45, %v305_v43 }
  0xad   : > { %v246_v48 = vrot.slane %v245_v46, 1 }
  0xae   : > { %v308_v49 = vrot.slane %v307_v47, 1 }
  0xaf   : > { %v247_v50 = vadd.f32 %v246_v48, %v245_v46 }
  0xb0   : > { %v309_v51 = vadd.f32 %v308_v49, %v307_v47 }
  0xb1   : > { %v248_v52 = vmul.f32 %v247_v50, %v237_v29 }
  0xb2   : > { %v310_v53 = vmul.f32 %v309_v51, %v237_v29 }
  0xb3   : > { %v249_v54 = vadd.f32 1e-05, %v248_v52 }
  0xb4   : > { %v311_v55 = vadd.f32 1e-05, %v310_v53 }
  0xb5   : > { %404 = vrsqrt.f32 %v249_v54  ;;  %vm256_vm4 = vweird.f32 %v249_v54 }
  0xb6   : > { %406 = vrsqrt.f32 %v311_v55  ;;  %vm318_vm7 = vweird.f32 %v311_v55 }
  0xbb   : > { %v405_v56 = vpop.eup %404 }
  0xbc   : > { %v407_v57 = vpop.eup %406  ;;  %v251_v58 = vmul.f32 %v405_v56, %v249_v54  ;;  %vm257_vm3 = vweird.f32 %v405_v56 }
  0xbd   : > { %v313_v59 = vmul.f32 %v407_v57, %v311_v55  ;;  %vm258_vm5 = vmor %vm256_vm4, %vm257_vm3  ;;  %vm319_vm6 = vweird.f32 %v407_v57 }
  0xbe   : > { %v252_v60 = vmul.f32 %v405_v56, %v251_v58  ;;  %vm320_vm8 = vmor %vm318_vm7, %vm319_vm6 }
  0xbf   : > { %v314_v61 = vmul.f32 %v407_v57, %v313_v59 }
  0xc0   : > { %v253_v62 = vmul.f32 0.5, %v252_v60 }
  0xc1   : > { %v315_v63 = vmul.f32 0.5, %v314_v61 }
  0xc2   : > { %v254_v0 = vsub.f32 1.5, %v253_v62 }
  0xc3   : > { %v316_v1 = vsub.f32 1.5, %v315_v63 }
  0xc4   : > { %v255_v3 = vmul.f32 %v405_v56, %v254_v0 }
  0xc5   : > { %v317_v6 = vmul.f32 %v407_v57, %v316_v1 }
  0xc6   : > { %v259_v4 = vsel %vm258_vm5, %v405_v56, %v255_v3 }
  0xc7   : > { %v260_v5 = vmul.f32 %v259_v4, %v194_v2  ;;  %v321_v10 = vsel %vm320_vm8, %v407_v57, %v317_v6 }
  0xc8   : > { %v322_v12 = vmul.f32 %v321_v10, %v194_v2 }
  0xc9   : > { %v261_v7 = vperm.slane %v260_v5, 2 }
  0xca   : > { %v323_v14 = vperm.slane %v322_v12, 0 }
  0xcb   : > { %v262_v9 = vmul.f32 %v261_v7, %v239_v34 }
  0xcc   : > { %v324_v15 = vmul.f32 %v323_v14, %v301_v35 }
  0xcd   : > { %v264_v11 = vadd.f32 %v263_v8, %v262_v9 }
  0xce   : > { %v326_v20 = vadd.f32 %v325_v16, %v324_v15 }
  0xcf   : > { %v265_v13 = vmul.f32 0.5, %v264_v11 }
  0xd1   : > { %408 = vtanh.f32 %v265_v13 }
  0xd7   : > { %v409_v17 = vpop.eup %408 }
  0xd8   : > { %v267_v18 = vadd.f32 1.0, %v409_v17 }
  0xda   : > { %v268_v19 = vmul.f32 0.5, %v267_v18 }
  0xdc   : > { %v327_v21 = vmul.f32 %v326_v20, %v268_v19 }
  0xde   : > { %328 = vst.msk [vmem:[%s192_s17] sm:$0xff] %vm223_vm1, %v327_v21 }
  0xdf PF: > { %s14_s15 = sadd.s32 1, %s416_s15  }
  0xe0   : > { %p11_p4 = scmp.ge.s32.totalorder %s14_s15, 6  }
  0xe2   :  { %13 = sbr.rel (!%p11_p4) target bundleno = 1 (0x1), region = 66 }

</bundles_post_ra>
